<compile_context>
chip_gen: v7x
topology: tpu7x:2x2x1
jax: 0.10.0
libtpu: 0.0.40
codegen_flags: <defaults>
</compile_context>

<pallas_src>
import math

import jax
import jax.numpy as jnp
from jax.experimental import pallas as pl
from jax.experimental.pallas import tpu as pltpu

_LANE = 128
_MIB = 1024 * 1024


def _sublane_multiple(dtype) -> int:
    """Native second-minor tile multiple for a dtype (8 f32 / 16 bf16 / 32 int8)."""
    itemsize = jnp.dtype(dtype).itemsize
    return {1: 32, 2: 16}.get(itemsize, 8)


def _vmem_budget():
    """(per-output-block byte target, vmem_limit_bytes), chosen per TPU generation."""
    try:
        cap = int(pltpu.get_tpu_info().vmem_capacity_bytes)
    except Exception:  # tracing off-TPU / older jax: assume the tightest (v7x) figure
        cap = 64 * _MIB
    # Double-buffered pipeline footprint ~= 2*(input blocks + output block) ~= 4x one
    # output block, so a 4 MiB target stays ~16 MiB in flight on every generation.
    target_block = min(4 * _MIB, max(256 * 1024, cap // 16))
    vmem_limit = int(min(cap // 2, 32 * _MIB))
    return target_block, vmem_limit


def _make_lane_concat_kernel(widths, offsets):
    """2D path: concat along the last (lane) axis; dtype cast fused into the store."""
    def kernel(*refs):
        in_refs, out_ref = refs[:-1], refs[-1]
        for x_ref, start, w in zip(in_refs, offsets, widths):
            out_ref[:, start:start + w] = x_ref[...].astype(out_ref.dtype)
    return kernel


def _make_sublane_concat_kernel(sizes, c_offsets):
    """3D path: concat along the second-to-last axis; lanes stay dense on `inner`."""
    def kernel(*refs):
        in_refs, out_ref = refs[:-1], refs[-1]
        for x_ref, start, c in zip(in_refs, c_offsets, sizes):
            out_ref[:, start:start + c, :] = x_ref[...].astype(out_ref.dtype)
    return kernel


def _make_dma_concat_kernel(widths, offsets, n_in):
    """HBM->HBM path: one strided DMA per input straight into its output lane slice."""
    def kernel(*refs):
        in_refs = refs[:n_in]
        out_ref = refs[n_in]
        sems = refs[n_in + 1]
        copies = []
        for idx, (x_ref, start, w) in enumerate(zip(in_refs, offsets, widths)):
            cp = pltpu.make_async_copy(x_ref, out_ref.at[:, start:start + w],
                                       sems.at[idx])
            cp.start()
            copies.append(cp)
        for cp in copies:
            cp.wait()
    return kernel


def concat_pallas(xs, dim=1):
    """torch.cat(xs, dim) equivalent via Pallas TPU kernels."""
    xs = list(xs)
    assert len(xs) >= 1, "torch.cat needs at least one tensor"
    ndim = xs[0].ndim
    dim = dim % ndim

    # torch.cat-style dtype promotion (performed inside the kernel).
    out_dtype = jnp.result_type(*[x.dtype for x in xs])

    base = xs[0].shape
    for x in xs:
        assert x.ndim == ndim
        for ax in range(ndim):
            if ax != dim:
                assert x.shape[ax] == base[ax], "non-concat dims must match"

    out_shape_full = list(base)
    out_shape_full[dim] = sum(x.shape[dim] for x in xs)
    out_shape_full = tuple(out_shape_full)

    # Drop zero-sized operands; handle degenerate outputs.
    xs = [x for x in xs if x.shape[dim] > 0]
    if not xs or any(s == 0 for s in out_shape_full):
        return jnp.zeros(out_shape_full, out_dtype)
    if len(xs) == 1:
        return xs[0].astype(out_dtype).reshape(out_shape_full)

    n = len(xs)
    outer = math.prod(base[:dim])
    inner = math.prod(base[dim + 1:])
    sizes = [x.shape[dim] for x in xs]
    widths = [c * inner for c in sizes]
    total_width = sum(widths)
    c_total = sum(sizes)

    offsets, c_offsets = [], []
    off = coff = 0
    for c, w in zip(sizes, widths):
        offsets.append(off)
        c_offsets.append(coff)
        off += w
        coff += c

    out_itemsize = jnp.dtype(out_dtype).itemsize
    in_itemsizes = [jnp.dtype(x.dtype).itemsize for x in xs]
    needs_cast = any(x.dtype != out_dtype for x in xs)

    # Honest scheduler hint: read each input in its source dtype, write once.
    bytes_read = sum(outer * w * isz for w, isz in zip(widths, in_itemsizes))
    bytes_written = outer * total_width * out_itemsize
    cost = pl.CostEstimate(flops=0, transcendentals=0,
                           bytes_accessed=bytes_read + bytes_written)

    target_block_bytes, vmem_limit = _vmem_budget()
    total_out_bytes = outer * total_width * out_itemsize
    big = total_out_bytes > 2 * target_block_bytes

    # Layout choice.
    row_align_dense = max(_sublane_multiple(out_dtype),
                          *[_sublane_multiple(x.dtype) for x in xs])
    lane_aligned = all(w % _LANE == 0 for w in widths)
    # Sublane-axis concat when lanes can stay reasonably dense AND either the lane
    # layout would be misaligned (masked vst per vreg), or `outer` (e.g. NCHW batch)
    # is too small to row-tile the dense layout at its sublane granularity.
    use_sublane_concat = inner >= _LANE and (
        (not lane_aligned) or (big and outer < 4 * row_align_dense))
    row_align = 1 if use_sublane_concat else row_align_dense

    min_rows = outer if outer <= row_align else row_align
    min_block_out_bytes = min_rows * total_width * out_itemsize

    # ---- Path B: smallest legal VMEM block still too big -> direct HBM->HBM DMA.
    if 4 * min_block_out_bytes > (vmem_limit * 3) // 4:
        if needs_cast:
            # TODO(synk): DMA cannot cast; rare mixed-dtype + huge-row case pays one
            # XLA promotion pass before the copy.
            xs = [x.astype(out_dtype) for x in xs]
        xs2d = [x.reshape(outer, w) for x, w in zip(xs, widths)]
        out2d = pl.pallas_call(
            _make_dma_concat_kernel(widths, offsets, n),
            out_shape=jax.ShapeDtypeStruct((outer, total_width), out_dtype),
            in_specs=[pl.BlockSpec(memory_space=pl.ANY)] * n,
            out_specs=pl.BlockSpec(memory_space=pl.ANY),
            scratch_shapes=[pltpu.SemaphoreType.DMA((n,))],
            compiler_params=pltpu.CompilerParams(vmem_limit_bytes=vmem_limit),
            cost_estimate=cost,
        )(*xs2d)
        return out2d.reshape(out_shape_full)

    # ---- Path A: pipelined VMEM copy, grid over rows, cast fused into the store.
    rows_budget = max(min_rows,
                      target_block_bytes // max(1, total_width * out_itemsize))
    if total_out_bytes <= 1 * _MIB:
        tile_rows = outer  # tiny concat: one block, pipelining not worth the steps
    else:
        # Aim for >= 8 grid steps when the data allows it: keeps input DMA / copy /
        # writeback overlapped and lets v7x's two TensorCores split the rows.
        tile_rows = min(rows_budget, pl.cdiv(outer, 8))
        tile_rows = max(row_align, (tile_rows // row_align) * row_align)
        tile_rows = min(tile_rows, outer)
    grid_rows = pl.cdiv(outer, tile_rows)

    compiler_params = pltpu.CompilerParams(
        dimension_semantics=("parallel",),
        vmem_limit_bytes=vmem_limit,
    )

    if use_sublane_concat:
        xs3d = [x.reshape(outer, c, inner) for x, c in zip(xs, sizes)]
        in_specs = [pl.BlockSpec((tile_rows, c, inner), lambda i: (i, 0, 0))
                    for c in sizes]
        out_spec = pl.BlockSpec((tile_rows, c_total, inner), lambda i: (i, 0, 0))
        out3d = pl.pallas_call(
            _make_sublane_concat_kernel(sizes, c_offsets),
            out_shape=jax.ShapeDtypeStruct((outer, c_total, inner), out_dtype),
            grid=(grid_rows,),
            in_specs=in_specs,
            out_specs=out_spec,
            compiler_params=compiler_params,
            cost_estimate=cost,
        )(*xs3d)
        return out3d.reshape(out_shape_full)

    xs2d = [x.reshape(outer, w) for x, w in zip(xs, widths)]
    in_specs = [pl.BlockSpec((tile_rows, w), lambda i: (i, 0)) for w in widths]
    out_spec = pl.BlockSpec((tile_rows, total_width), lambda i: (i, 0))
    out2d = pl.pallas_call(
        _make_lane_concat_kernel(widths, offsets),
        out_shape=jax.ShapeDtypeStruct((outer, total_width), out_dtype),
        grid=(grid_rows,),
        in_specs=in_specs,
        out_specs=out_spec,
        compiler_params=compiler_params,
        cost_estimate=cost,
    )(*xs2d)
    return out2d.reshape(out_shape_full)


if __name__ == "__main__":
    key = jax.random.PRNGKey(0)
    k0, k1, k2, k3 = jax.random.split(key, 4)

    # 1) YOLO-style NCHW channel concat (lane-aligned 2D path).
    x0 = jax.random.normal(k0, (2, 4, 16, 16), dtype=jnp.float32)
    x1 = jax.random.normal(k1, (2, 6, 16, 16), dtype=jnp.float32)
    x2 = jax.random.normal(k2, (2, 2, 16, 16), dtype=jnp.float32)
    out = jax.block_until_ready(concat_pallas([x0, x1, x2], dim=1))
    ref = jnp.concatenate([x0, x1, x2], axis=1)
    assert out.shape == (2, 12, 16, 16) and out.dtype == ref.dtype
    assert jnp.array_equal(out, ref), "mismatch: dim=1 f32 concat"

    # 2) Mixed dtypes: promotion happens inside the kernel store.
    x1b = x1.astype(jnp.bfloat16)
    out = jax.block_until_ready(concat_pallas([x0, x1b], dim=1))
    ref = jnp.concatenate([x0, x1b.astype(jnp.float32)], axis=1)
    assert out.dtype == jnp.float32
    assert jnp.array_equal(out, ref), "mismatch: mixed-dtype concat"

    # 3) Lane-misaligned spatial size (H*W = 400): sublane-axis (3D) concat path.
    y0 = jax.random.normal(k0, (2, 3, 20, 20), dtype=jnp.float32)
    y1 = jax.random.normal(k3, (2, 5, 20, 20), dtype=jnp.float32)
    out = jax.block_until_ready(concat_pallas([y0, y1], dim=1))
    assert jnp.array_equal(out, jnp.concatenate([y0, y1], axis=1)), \
        "mismatch: misaligned dim=1 concat"

    # 4) Other concat axes exercise the general flatten.
    z0 = jax.random.normal(k1, (2, 4, 8, 16), dtype=jnp.float32)
    z1 = jax.random.normal(k2, (2, 4, 8, 16), dtype=jnp.float32)
    out = jax.block_until_ready(concat_pallas([z0, z1], dim=2))
    assert jnp.array_equal(out, jnp.concatenate([z0, z1], axis=2)), \
        "mismatch: dim=2 concat"

    w0 = jax.random.normal(k2, (2, 4, 16, 8), dtype=jnp.float32)
    w1 = jax.random.normal(k3, (2, 4, 16, 24), dtype=jnp.float32)
    out = jax.block_until_ready(concat_pallas([w0, w1], dim=-1))
    assert jnp.array_equal(out, jnp.concatenate([w0, w1], axis=-1)), \
        "mismatch: dim=-1 concat"

    print("KERNEL_OK")
</pallas_src>

<mosaic_0001>
module attributes {stable_mosaic.version = 11 : i64} {
  func.func @kernel(%arg0: i32, %arg1: memref<2x1024xf32, #tpu.memory_space<vmem>>, %arg2: memref<2x1536xf32, #tpu.memory_space<vmem>>, %arg3: memref<2x512xf32, #tpu.memory_space<vmem>>, %arg4: memref<2x3072xf32, #tpu.memory_space<vmem>>) attributes {dimension_semantics = [#tpu.dimension_semantics<parallel>], iteration_bounds = array<i64: 1>, scalar_prefetch = 0 : i64, scratch_operands = 0 : i64, tpu.core_type = #tpu.core_type<tc>, window_params = [{transform_indices = @transform_0, window_bounds = array<i64: 2, 1024>}, {transform_indices = @transform_1, window_bounds = array<i64: 2, 1536>}, {transform_indices = @transform_2, window_bounds = array<i64: 2, 512>}, {transform_indices = @transform_3, window_bounds = array<i64: 2, 3072>}]} {
    %c0 = arith.constant 0 : index
    %c0_0 = arith.constant 0 : index
    %0 = vector.load %arg1[%c0, %c0_0] : memref<2x1024xf32, #tpu.memory_space<vmem>>, vector<2x1024xf32>
    %c0_1 = arith.constant 0 : index
    %c0_2 = arith.constant 0 : index
    %1 = vector.load %arg4[%c0_1, %c0_2] : memref<2x3072xf32, #tpu.memory_space<vmem>>, vector<2x1024xf32>
    tpu.vector_store %arg4[%c0_1, %c0_2], %0 {strides = array<i32>} : memref<2x3072xf32, #tpu.memory_space<vmem>>, vector<2x1024xf32>,
    %c0_3 = arith.constant 0 : index
    %c0_4 = arith.constant 0 : index
    %2 = vector.load %arg2[%c0_3, %c0_4] : memref<2x1536xf32, #tpu.memory_space<vmem>>, vector<2x1536xf32>
    %c0_5 = arith.constant 0 : index
    %c1024 = arith.constant 1024 : index
    %3 = vector.load %arg4[%c0_5, %c1024] : memref<2x3072xf32, #tpu.memory_space<vmem>>, vector<2x1536xf32>
    tpu.vector_store %arg4[%c0_5, %c1024], %2 {strides = array<i32>} : memref<2x3072xf32, #tpu.memory_space<vmem>>, vector<2x1536xf32>,
    %c0_6 = arith.constant 0 : index
    %c0_7 = arith.constant 0 : index
    %4 = vector.load %arg3[%c0_6, %c0_7] : memref<2x512xf32, #tpu.memory_space<vmem>>, vector<2x512xf32>
    %c0_8 = arith.constant 0 : index
    %c2560 = arith.constant 2560 : index
    %5 = vector.load %arg4[%c0_8, %c2560] : memref<2x3072xf32, #tpu.memory_space<vmem>>, vector<2x512xf32>
    tpu.vector_store %arg4[%c0_8, %c2560], %4 {strides = array<i32>} : memref<2x3072xf32, #tpu.memory_space<vmem>>, vector<2x512xf32>,
    return
  }
  func.func @transform_0(%arg0: i32) -> (i32, i32) {
    %c0_i32 = arith.constant 0 : i32
    %c0_i32_0 = arith.constant 0 : i32
    return %arg0, %c0_i32 : i32, i32
  }
  func.func @transform_1(%arg0: i32) -> (i32, i32) {
    %c0_i32 = arith.constant 0 : i32
    %c0_i32_0 = arith.constant 0 : i32
    return %arg0, %c0_i32 : i32, i32
  }
  func.func @transform_2(%arg0: i32) -> (i32, i32) {
    %c0_i32 = arith.constant 0 : i32
    %c0_i32_0 = arith.constant 0 : i32
    return %arg0, %c0_i32 : i32, i32
  }
  func.func @transform_3(%arg0: i32) -> (i32, i32) {
    %c0_i32 = arith.constant 0 : i32
    %c0_i32_0 = arith.constant 0 : i32
    return %arg0, %c0_i32 : i32, i32
  }
}

</mosaic_0001>

<bundles_post_ra>
// kernel: tpu_custom_call.1
= control target key start
LH: loop header
LB: loop body
LE: loop exit
PB: predicated region body
PF: predicated region fallthrough
CT: control target
= control target key end

     0   :  { %8 = vsyncpa [#allocation3], 0  ;;  %s248_s0 = inlined_call_operand.hbm [shape: f32[2,1024], index: 0, kind: input, shape index: {}]   ;;  %s249_s1 = inlined_call_operand.hbm [shape: f32[2,1536], index: 1, kind: input, shape index: {}]   ;;  %s250_s2 = inlined_call_operand.hbm [shape: f32[2,512], index: 2, kind: input, shape index: {}]   ;;  %s251_s3 = inlined_call_operand.hbm [shape: f32[2,3072], index: 3, kind: output, shape index: {}]  }
   0x1   :  { %9 = vsyncpa [#allocation6], 0 }
   0x2   :  { %10 = vsyncpa [#allocation4], 0  ;;  %s176_s12 = smov [#allocation5]   ;;  %s177_s14 = smov [#allocation2]  }
   0x3   :  { %s27_s13 = sshll.u32 %s176_s12, 4  ;;  %s17_s15 = sshll.u32 %s177_s14, 4  ;;  %s28_s13 = int_to_ptr.vmem [resolvable:$true] %s27_s13  ;;  %s18_s15 = int_to_ptr.vmem [resolvable:$true] %s17_s15 }
   0x4   :  { %s82_s18 = scalar_lea.hbm %s249_s1, 384 }
   0x5   :  { %p83_p0 = scmp.ne.s32.totalorder %s249_s1, %s82_s18  ;;  %p86_p1 = scmp.lt.u32.totalorder %s82_s18, %s249_s1 }
   0x7   :  { %p88_p2 = pnand %p86_p1, %p83_p0 }
   0x9   :  { %91 = shalt.err (!%p88_p2)
}
   0xa   :  { %s92_s23 = scalar_lea.vmem %s28_s13, 384  ;;  %p97_p4 = scmp.lt.s32.totalorder %s28_s13, %s28_s13 }
   0xb   :  { %p93_p3 = scmp.ne.s32.totalorder %s28_s13, %s92_s23  ;;  %p98_p5 = scmp.lt.s32.totalorder %s92_s23, %s92_s23 }
   0xd   :  { %p99_p6 = por %p98_p5, %p97_p4 }
   0xf   :  { %p100_p7 = pnand %p99_p6, %p93_p3 }
  0x11   :  { %103 = shalt.err (!%p100_p7)
}
  0x12   :  { %30 = dma.hbm_to_vmem [thread:$0]  %s249_s1, 384, %s28_s13, [#allocation6]  }
  0x13   :  { %s104_s28 = scalar_lea.hbm %s248_s0, 256 }
  0x14   :  { %p105_p8 = scmp.ne.s32.totalorder %s248_s0, %s104_s28  ;;  %p108_p9 = scmp.lt.u32.totalorder %s104_s28, %s248_s0 }
  0x16   :  { %p110_p10 = pnand %p108_p9, %p105_p8 }
  0x18   :  { %113 = shalt.err (!%p110_p10)
}
  0x19   :  { %s114_s6 = scalar_lea.vmem %s18_s15, 256  ;;  %p119_p12 = scmp.lt.s32.totalorder %s18_s15, %s18_s15 }
  0x1a   :  { %p115_p11 = scmp.ne.s32.totalorder %s18_s15, %s114_s6  ;;  %p120_p13 = scmp.lt.s32.totalorder %s114_s6, %s114_s6 }
  0x1c   :  { %p121_p0 = por %p120_p13, %p119_p12 }
  0x1e   :  { %p122_p1 = pnand %p121_p0, %p115_p11 }
  0x20   :  { %125 = shalt.err (!%p122_p1)
}
  0x21   :  { %20 = dma.hbm_to_vmem [thread:$0]  %s248_s0, 256, %s18_s15, [#allocation3]  }
  0x22   :  { %s178_s8 = smov [#allocation7]   ;;  %s126_s12 = scalar_lea.hbm %s250_s2, 128 }
  0x23   :  { %s37_s9 = sshll.u32 %s178_s8, 4  ;;  %p127_p2 = scmp.ne.s32.totalorder %s250_s2, %s126_s12  ;;  %s38_s9 = int_to_ptr.vmem [resolvable:$true] %s37_s9 }
  0x24   :  { %p130_p3 = scmp.lt.u32.totalorder %s126_s12, %s250_s2 }
  0x26   :  { %p132_p4 = pnand %p130_p3, %p127_p2 }
  0x28   :  { %135 = shalt.err (!%p132_p4)
}
  0x29   :  { %s136_s18 = scalar_lea.vmem %s38_s9, 128  ;;  %p141_p6 = scmp.lt.s32.totalorder %s38_s9, %s38_s9 }
  0x2a   :  { %p137_p5 = scmp.ne.s32.totalorder %s38_s9, %s136_s18  ;;  %p142_p7 = scmp.lt.s32.totalorder %s136_s18, %s136_s18 }
  0x2c   :  { %p143_p8 = por %p142_p7, %p141_p6 }
  0x2e   :  { %p144_p9 = pnand %p143_p8, %p137_p5 }
  0x30   :  { %147 = shalt.err (!%p144_p9)
}
  0x31   :  { %40 = dma.hbm_to_vmem [thread:$0]  %s250_s2, 128, %s38_s9, [#allocation6]  }
  0x32   :  { %170 = dma.done.wait [#allocation3], 256  }
  0x33   :  { %171 = vsyncadd [#allocation3], 4294967040 }
  0x34   :  { %172 = dma.done.wait [#allocation6], 512  }
  0x35   :  { %173 = vsyncadd [#allocation6], 4294966784  ;;  %s179_s19 = smov [#allocation8]   ;;  %v50_v0 = vld [vmem:[#allocation2] sm:$0xff]  ;;  %v51_v1 = vld [vmem:[#allocation2 + $0x8] sm:$0xff] }
  0x36   :  { %s68_s20 = sshll.u32 %s179_s19, 4  ;;  %v54_v2 = vld [vmem:[#allocation5] sm:$0xff]  ;;  %52 = vst [vmem:[#allocation8] sm:$0xff] %v50_v0  ;;  %53 = vst [vmem:[#allocation8 + $0x8] sm:$0xff] %v51_v1  ;;  %v55_v3 = vld [vmem:[#allocation5 + $0x8] sm:$0xff]  ;;  %s69_s20 = int_to_ptr.vmem [resolvable:$true] %s68_s20 }
  0x37   :  { %57 = vst [vmem:[#allocation8 + $0x10] sm:$0xff] %v54_v2  ;;  %v56_v4 = vld [vmem:[#allocation5 + $0x10] sm:$0xff]  ;;  %v60_v5 = vld [vmem:[#allocation7] sm:$0xff]  ;;  %58 = vst [vmem:[#allocation8 + $0x18] sm:$0xff] %v55_v3  ;;  %s148_s2 = scalar_lea.vmem %s69_s20, 768  ;;  %p153_p11 = scmp.lt.s32.totalorder %s69_s20, %s69_s20 }
  0x38   :  { %59 = vst [vmem:[#allocation8 + $0x20] sm:$0xff] %v56_v4  ;;  %61 = vst [vmem:[#allocation8 + $0x28] sm:$0xff] %v60_v5  ;;  %p149_p10 = scmp.ne.s32.totalorder %s69_s20, %s148_s2  ;;  %p154_p12 = scmp.lt.s32.totalorder %s148_s2, %s148_s2 }
  0x3a   :  { %p155_p13 = por %p154_p12, %p153_p11 }
  0x3c   :  { %p156_p0 = pnand %p155_p13, %p149_p10 }
  0x3e   :  { %159 = shalt.err (!%p156_p0)
}
  0x3f   :  { %s160_s23 = scalar_lea.hbm %s251_s3, 768 }
  0x40   :  { %p161_p1 = scmp.ne.s32.totalorder %s251_s3, %s160_s23  ;;  %p164_p2 = scmp.lt.u32.totalorder %s160_s23, %s251_s3 }
  0x42   :  { %p166_p3 = pnand %p164_p2, %p161_p1 }
  0x44   :  { %169 = shalt.err (!%p166_p3)
}
  0x45   :  { %71 = dma.vmem_to_hbm [thread:$0]  %s69_s20, 768, %s251_s3, [#allocation4]  }
  0x46   :  { %174 = dma.done.wait [#allocation4], 768  }
  0x47   :  { %175 = vsyncadd [#allocation4], 4294966528 }
  0x48   :  { %75 = vsyncpa [#allocation3], 1 }
  0x49   :  { %76 = vsyncpa [#allocation6], 1 }
  0x4a   :  { %77 = vsyncpa [#allocation4], 1 }

</bundles_post_ra>
